<compile_context>
chip_gen: v5e
topology: v5e:2x2
jax: 0.10.0
libtpu: 0.0.40
codegen_flags: <defaults>
</compile_context>

<pallas_src>
import functools

import jax
import jax.numpy as jnp
from jax.experimental import pallas as pl
from jax.experimental.pallas import tpu as pltpu

IN_DIM = 784
HID_DIM = 200
OUT_DIM = 10
HID_PAD = 256   # 200 -> 256: lane-dense MXU tiles (multiple of 128)
OUT_PAD = 128   # 10  -> 128: lane-dense (unmasked) output stores


def _round_up(n, m):
    return (n + m - 1) // m * m


def _tile_config():
    """Generation-aware (block_batch, vmem_limit_bytes).

    v7x has only 64 MiB VMEM per TensorCore -> smaller tiles + headroom below physical.
    v5e/v6e have 128 MiB -> larger tiles to amortize the ~0.35 us per-grid-step overhead.
    """
    vmem_cap = None
    try:
        info = pltpu.get_tpu_info()
        vmem_cap = getattr(info, "vmem_capacity_bytes", None)
    except Exception:
        vmem_cap = None
    if vmem_cap is None:
        # Unknown hardware: conservative settings that fit every generation.
        return 1024, 48 << 20
    if vmem_cap <= (64 << 20):
        # v7x-class: do NOT set the limit at physical capacity; leave scratch/pipeline headroom.
        return 2048, 56 << 20
    # v5e / v6e (128 MiB physical).
    return 4096, 100 << 20


def mlp_kernel(x_ref, w1_ref, b1_ref, w2_ref, b2_ref, w3_ref, b3_ref, o_ref):
    # In-kernel cast to bf16 (no-op if x is already bf16): avoids a separate HBM cast pass.
    x = x_ref[...].astype(jnp.bfloat16)                               # (tb, 784)
    # bf16 operands -> MXU, f32 accumulation, f32 elementwise epilogue (v5e VPU has no bf16 ALU).
    h1 = jnp.dot(x, w1_ref[...], preferred_element_type=jnp.float32) + b1_ref[...]
    h1 = jnp.maximum(h1, 0.0).astype(jnp.bfloat16)                    # (tb, 256)
    h2 = jnp.dot(h1, w2_ref[...], preferred_element_type=jnp.float32) + b2_ref[...]
    h2 = jnp.maximum(h2, 0.0).astype(jnp.bfloat16)                    # (tb, 256)
    y = jnp.dot(h2, w3_ref[...], preferred_element_type=jnp.float32) + b3_ref[...]
    o_ref[...] = y.astype(o_ref.dtype)                                # (tb, 128) bf16


@functools.partial(
    jax.jit, static_argnames=("block_batch", "vmem_limit_bytes", "out_dtype"))
def _mnist_2nn_padded(x, w1, b1, w2, b2, w3, b3, *, block_batch, vmem_limit_bytes,
                      out_dtype):
    batch = x.shape[0]
    tb = block_batch
    grid = (pl.cdiv(batch, tb),)   # ragged trailing block handled by Pallas

    resident = lambda i: (0, 0)    # weights/biases: same block every step -> stay in VMEM

    weight_bytes = (IN_DIM * HID_PAD + HID_PAD * HID_PAD + HID_PAD * OUT_PAD) * 2
    bias_bytes = (2 * HID_PAD + OUT_PAD) * 4
    flops = 2 * batch * (IN_DIM * HID_PAD + HID_PAD * HID_PAD + HID_PAD * OUT_PAD)
    bytes_accessed = (batch * IN_DIM * x.dtype.itemsize               # x read
                      + batch * OUT_PAD * jnp.dtype(out_dtype).itemsize  # out write
                      + weight_bytes + bias_bytes)

    return pl.pallas_call(
        mlp_kernel,
        out_shape=jax.ShapeDtypeStruct((batch, OUT_PAD), out_dtype),
        grid=grid,
        in_specs=[
            pl.BlockSpec((tb, IN_DIM), lambda i: (i, 0)),      # x: tiled over batch
            pl.BlockSpec((IN_DIM, HID_PAD), resident),         # w1 (bf16, resident)
            pl.BlockSpec((1, HID_PAD), resident),              # b1 (f32)
            pl.BlockSpec((HID_PAD, HID_PAD), resident),        # w2
            pl.BlockSpec((1, HID_PAD), resident),              # b2
            pl.BlockSpec((HID_PAD, OUT_PAD), resident),        # w3
            pl.BlockSpec((1, OUT_PAD), resident),              # b3
        ],
        out_specs=pl.BlockSpec((tb, OUT_PAD), lambda i: (i, 0)),
        compiler_params=pltpu.CompilerParams(
            # batch tiles are independent -> shard across v7x's 2 TensorCores
            dimension_semantics=("parallel",),
            vmem_limit_bytes=vmem_limit_bytes,
        ),
        cost_estimate=pl.CostEstimate(
            flops=flops, transcendentals=0, bytes_accessed=bytes_accessed),
    )(x, w1, b1, w2, b2, w3, b3)


def prepare_params(w1, b1, w2, b2, w3, b3):
    """Zero-pad 200->256 / 10->128 once and cast weights to bf16 (biases stay f32)."""
    def pad2(a, rows, cols):
        return jnp.pad(a, ((0, rows - a.shape[0]), (0, cols - a.shape[1])))
    w1p = pad2(w1, IN_DIM, HID_PAD).astype(jnp.bfloat16)
    b1p = pad2(b1, 1, HID_PAD).astype(jnp.float32)
    w2p = pad2(w2, HID_PAD, HID_PAD).astype(jnp.bfloat16)
    b2p = pad2(b2, 1, HID_PAD).astype(jnp.float32)
    w3p = pad2(w3, HID_PAD, OUT_PAD).astype(jnp.bfloat16)
    b3p = pad2(b3, 1, OUT_PAD).astype(jnp.float32)
    return w1p, b1p, w2p, b2p, w3p, b3p


def mnist_2nn_forward_padded(x, params, *, block_batch=None, out_dtype=jnp.bfloat16):
    """x: (batch, 784) f32 or bf16 (bf16 at source is the lowest-HBM-traffic path).

    Returns the raw lane-dense kernel output (batch, 128) in out_dtype; columns 10..127 are
    zero. Preferred entry point: consumers can fuse the [:, :10] slice themselves instead of
    paying an extra HBM pass to materialize it.
    """
    batch = x.shape[0]
    default_tb, vmem_limit = _tile_config()
    tb = default_tb if block_batch is None else block_batch
    tb = _round_up(min(tb, _round_up(batch, 8)), 8)
    return _mnist_2nn_padded(x, *params, block_batch=tb,
                             vmem_limit_bytes=vmem_limit, out_dtype=out_dtype)


def mnist_2nn_forward(x, params, *, block_batch=None, out_dtype=jnp.bfloat16):
    """Convenience wrapper returning (batch, 10) logits (matches the PyTorch module).

    Note: the [:, :10] slice below materializes a copy; latency-critical callers should use
    mnist_2nn_forward_padded() and fuse the slice into their consumer.
    """
    y_padded = mnist_2nn_forward_padded(x, params, block_batch=block_batch,
                                        out_dtype=out_dtype)
    return y_padded[:, :OUT_DIM]


def init_linear_params(key, fan_in, fan_out):
    # Mimics PyTorch nn.Linear default init: U(-1/sqrt(fan_in), 1/sqrt(fan_in)).
    kw, kb = jax.random.split(key)
    bound = 1.0 / jnp.sqrt(jnp.float32(fan_in))
    w = jax.random.uniform(kw, (fan_in, fan_out), jnp.float32, -bound, bound)
    b = jax.random.uniform(kb, (1, fan_out), jnp.float32, -bound, bound)
    return w, b


if __name__ == "__main__":
    key = jax.random.PRNGKey(0)
    kx, k1, k2, k3 = jax.random.split(key, 4)

    batch = 8   # NOTE: at batch=8 the call is latency-bound; the bf16/traffic wins show up
                # at real batches (>=256). Semantics are identical either way.
    x = jax.random.normal(kx, (batch, IN_DIM), jnp.float32)

    w1, b1 = init_linear_params(k1, IN_DIM, HID_DIM)
    w2, b2 = init_linear_params(k2, HID_DIM, HID_DIM)
    w3, b3 = init_linear_params(k3, HID_DIM, OUT_DIM)

    params = prepare_params(w1, b1, w2, b2, w3, b3)
    y = mnist_2nn_forward(x, params)            # bf16 (batch, 10)
    jax.block_until_ready(y)
    assert y.shape == (batch, OUT_DIM)
    y_f32 = y.astype(jnp.float32)

    # Reference 1: same bf16-operand / f32-accumulate numerics as the kernel.
    xb = x.astype(jnp.bfloat16)
    w1b, w2b, w3b = (w.astype(jnp.bfloat16) for w in (w1, w2, w3))
    h1 = jnp.maximum(jnp.dot(xb, w1b, preferred_element_type=jnp.float32) + b1, 0.0)
    h2 = jnp.maximum(
        jnp.dot(h1.astype(jnp.bfloat16), w2b, preferred_element_type=jnp.float32) + b2, 0.0)
    y_bf16_ref = jnp.dot(h2.astype(jnp.bfloat16), w3b,
                         preferred_element_type=jnp.float32) + b3
    assert jnp.allclose(y_f32, y_bf16_ref, atol=2e-2, rtol=2e-2)

    # Reference 2: original f32 PyTorch semantics (loose tolerance for bf16 operands/output).
    h1f = jnp.maximum(x @ w1 + b1, 0.0)
    h2f = jnp.maximum(h1f @ w2 + b2, 0.0)
    y_f32_ref = h2f @ w3 + b3
    assert jnp.allclose(y_f32, y_f32_ref, atol=5e-2, rtol=5e-2)

    print("KERNEL_OK")
</pallas_src>

<mosaic_0001>
module attributes {stable_mosaic.version = 11 : i64} {
  func.func @mlp_kernel(%arg0: i32, %arg1: memref<8x784xf32, #tpu.memory_space<vmem>>, %arg2: memref<784x256xbf16, #tpu.memory_space<vmem>>, %arg3: memref<1x256xf32, #tpu.memory_space<vmem>>, %arg4: memref<256x256xbf16, #tpu.memory_space<vmem>>, %arg5: memref<1x256xf32, #tpu.memory_space<vmem>>, %arg6: memref<256x128xbf16, #tpu.memory_space<vmem>>, %arg7: memref<1x128xf32, #tpu.memory_space<vmem>>, %arg8: memref<8x128xbf16, #tpu.memory_space<vmem>>) attributes {dimension_semantics = [#tpu.dimension_semantics<parallel>], iteration_bounds = array<i64: 1>, scalar_prefetch = 0 : i64, scratch_operands = 0 : i64, tpu.core_type = #tpu.core_type<tc>, window_params = [{transform_indices = @transform_0, window_bounds = array<i64: 8, 784>}, {pipeline_mode = #tpu.pipeline_mode<synchronous>, transform_indices = @transform_1, window_bounds = array<i64: 784, 256>}, {pipeline_mode = #tpu.pipeline_mode<synchronous>, transform_indices = @transform_2, window_bounds = array<i64: 1, 256>}, {pipeline_mode = #tpu.pipeline_mode<synchronous>, transform_indices = @transform_3, window_bounds = array<i64: 256, 256>}, {pipeline_mode = #tpu.pipeline_mode<synchronous>, transform_indices = @transform_4, window_bounds = array<i64: 1, 256>}, {pipeline_mode = #tpu.pipeline_mode<synchronous>, transform_indices = @transform_5, window_bounds = array<i64: 256, 128>}, {pipeline_mode = #tpu.pipeline_mode<synchronous>, transform_indices = @transform_6, window_bounds = array<i64: 1, 128>}, {transform_indices = @transform_7, window_bounds = array<i64: 8, 128>}]} {
    %c0 = arith.constant 0 : index
    %c0_0 = arith.constant 0 : index
    %0 = vector.load %arg1[%c0, %c0_0] : memref<8x784xf32, #tpu.memory_space<vmem>>, vector<8x784xf32>
    %1 = arith.truncf %0 : vector<8x784xf32> to vector<8x784xbf16>
    %c0_1 = arith.constant 0 : index
    %c0_2 = arith.constant 0 : index
    %2 = vector.load %arg2[%c0_1, %c0_2] : memref<784x256xbf16, #tpu.memory_space<vmem>>, vector<784x256xbf16>
    %cst = arith.constant dense<0.000000e+00> : vector<8x256xf32>
    %3 = tpu.matmul %1, %2, %cst {dimension_numbers = #tpu.dot_dimension_numbers<[1], [0], [0], [1], [0, 0, 1, 1], [], []>} : vector<8x784xbf16>, vector<784x256xbf16>, vector<8x256xf32> -> vector<8x256xf32>
    %c0_3 = arith.constant 0 : index
    %c0_4 = arith.constant 0 : index
    %4 = vector.load %arg3[%c0_3, %c0_4] : memref<1x256xf32, #tpu.memory_space<vmem>>, vector<1x256xf32>
    %5 = vector.broadcast %4 : vector<1x256xf32> to vector<8x256xf32>
    %6 = arith.addf %3, %5 : vector<8x256xf32>
    %cst_5 = arith.constant 0.000000e+00 : f32
    %7 = vector.broadcast %cst_5 : f32 to vector<8x256xf32>
    %8 = arith.maximumf %6, %7 : vector<8x256xf32>
    %9 = arith.truncf %8 : vector<8x256xf32> to vector<8x256xbf16>
    %c0_6 = arith.constant 0 : index
    %c0_7 = arith.constant 0 : index
    %10 = vector.load %arg4[%c0_6, %c0_7] : memref<256x256xbf16, #tpu.memory_space<vmem>>, vector<256x256xbf16>
    %cst_8 = arith.constant dense<0.000000e+00> : vector<8x256xf32>
    %11 = tpu.matmul %9, %10, %cst_8 {dimension_numbers = #tpu.dot_dimension_numbers<[1], [0], [0], [1], [0, 0, 1, 1], [], []>} : vector<8x256xbf16>, vector<256x256xbf16>, vector<8x256xf32> -> vector<8x256xf32>
    %c0_9 = arith.constant 0 : index
    %c0_10 = arith.constant 0 : index
    %12 = vector.load %arg5[%c0_9, %c0_10] : memref<1x256xf32, #tpu.memory_space<vmem>>, vector<1x256xf32>
    %13 = vector.broadcast %12 : vector<1x256xf32> to vector<8x256xf32>
    %14 = arith.addf %11, %13 : vector<8x256xf32>
    %cst_11 = arith.constant 0.000000e+00 : f32
    %15 = vector.broadcast %cst_11 : f32 to vector<8x256xf32>
    %16 = arith.maximumf %14, %15 : vector<8x256xf32>
    %17 = arith.truncf %16 : vector<8x256xf32> to vector<8x256xbf16>
    %c0_12 = arith.constant 0 : index
    %c0_13 = arith.constant 0 : index
    %18 = vector.load %arg6[%c0_12, %c0_13] : memref<256x128xbf16, #tpu.memory_space<vmem>>, vector<256x128xbf16>
    %cst_14 = arith.constant dense<0.000000e+00> : vector<8x128xf32>
    %19 = tpu.matmul %17, %18, %cst_14 {dimension_numbers = #tpu.dot_dimension_numbers<[1], [0], [0], [1], [0, 0, 1, 1], [], []>} : vector<8x256xbf16>, vector<256x128xbf16>, vector<8x128xf32> -> vector<8x128xf32>
    %c0_15 = arith.constant 0 : index
    %c0_16 = arith.constant 0 : index
    %20 = vector.load %arg7[%c0_15, %c0_16] : memref<1x128xf32, #tpu.memory_space<vmem>>, vector<1x128xf32>
    %21 = vector.broadcast %20 : vector<1x128xf32> to vector<8x128xf32>
    %22 = arith.addf %19, %21 : vector<8x128xf32>
    %23 = arith.truncf %22 : vector<8x128xf32> to vector<8x128xbf16>
    %c0_17 = arith.constant 0 : index
    %c0_18 = arith.constant 0 : index
    %24 = vector.load %arg8[%c0_17, %c0_18] : memref<8x128xbf16, #tpu.memory_space<vmem>>, vector<8x128xbf16>
    tpu.vector_store %arg8[%c0_17, %c0_18], %23 {strides = array<i32>} : memref<8x128xbf16, #tpu.memory_space<vmem>>, vector<8x128xbf16>,
    return
  }
  func.func @transform_0(%arg0: i32) -> (i32, i32) {
    %c0_i32 = arith.constant 0 : i32
    %c0_i32_0 = arith.constant 0 : i32
    return %arg0, %c0_i32 : i32, i32
  }
  func.func @transform_1(%arg0: i32) -> (i32, i32) {
    %c0_i32 = arith.constant 0 : i32
    %c0_i32_0 = arith.constant 0 : i32
    %c0_i32_1 = arith.constant 0 : i32
    return %c0_i32, %c0_i32_0 : i32, i32
  }
  func.func @transform_2(%arg0: i32) -> (i32, i32) {
    %c0_i32 = arith.constant 0 : i32
    %c0_i32_0 = arith.constant 0 : i32
    %c0_i32_1 = arith.constant 0 : i32
    return %c0_i32, %c0_i32_0 : i32, i32
  }
  func.func @transform_3(%arg0: i32) -> (i32, i32) {
    %c0_i32 = arith.constant 0 : i32
    %c0_i32_0 = arith.constant 0 : i32
    %c0_i32_1 = arith.constant 0 : i32
    return %c0_i32, %c0_i32_0 : i32, i32
  }
  func.func @transform_4(%arg0: i32) -> (i32, i32) {
    %c0_i32 = arith.constant 0 : i32
    %c0_i32_0 = arith.constant 0 : i32
    %c0_i32_1 = arith.constant 0 : i32
    return %c0_i32, %c0_i32_0 : i32, i32
  }
  func.func @transform_5(%arg0: i32) -> (i32, i32) {
    %c0_i32 = arith.constant 0 : i32
    %c0_i32_0 = arith.constant 0 : i32
    %c0_i32_1 = arith.constant 0 : i32
    return %c0_i32, %c0_i32_0 : i32, i32
  }
  func.func @transform_6(%arg0: i32) -> (i32, i32) {
    %c0_i32 = arith.constant 0 : i32
    %c0_i32_0 = arith.constant 0 : i32
    %c0_i32_1 = arith.constant 0 : i32
    return %c0_i32, %c0_i32_0 : i32, i32
  }
  func.func @transform_7(%arg0: i32) -> (i32, i32) {
    %c0_i32 = arith.constant 0 : i32
    %c0_i32_0 = arith.constant 0 : i32
    return %arg0, %c0_i32 : i32, i32
  }
}

</mosaic_0001>

<bundles_post_ra>
// kernel: _mnist_2nn_padded.1
= control target key start
LH: loop header
LB: loop body
LE: loop exit
PB: predicated region body
PF: predicated region fallthrough
CT: control target
= control target key end

     0   :  { %12 = vsyncpa [#allocation3], 0  ;;  %s2336_s0 = inlined_call_operand.hbm [shape: f32[8,784], index: 0, kind: input, shape index: {}]   ;;  %s2337_s1 = inlined_call_operand.hbm [shape: bf16[784,256], index: 1, kind: input, shape index: {}]   ;;  %s2338_s2 = inlined_call_operand.hbm [shape: f32[1,256], index: 2, kind: input, shape index: {}]   ;;  %s2339_s3 = inlined_call_operand.hbm [shape: bf16[256,256], index: 3, kind: input, shape index: {}]   ;;  %s2340_s4 = inlined_call_operand.vmem [shape: f32[1,256], index: 4, kind: input, shape index: {}]   ;;  %s2341_s5 = inlined_call_operand.hbm [shape: bf16[256,128], index: 5, kind: input, shape index: {}]   ;;  %s2342_s6 = inlined_call_operand.vmem [shape: f32[1,128], index: 6, kind: input, shape index: {}]   ;;  %s2343_s7 = inlined_call_operand.hbm [shape: bf16[8,128], index: 7, kind: output, shape index: {}]  }
   0x1   :  { %13 = vsyncpa [#allocation6], 0 }
   0x2   :  { %14 = vsyncpa [#allocation9], 0  ;;  %s31_s26 = sshll.u32 %s2337_s1, 4  ;;  %s32_s26 = int_to_ptr.hbm [resolvable:$true] %s31_s26 }
   0x3   :  { %15 = vsyncpa [#allocation4], 0  ;;  %s2228_s27 = smov [#allocation5]   ;;  %s55_s8 = sshll.u32 %s2339_s3, 4  ;;  %s56_s8 = int_to_ptr.hbm [resolvable:$true] %s55_s8 }
   0x4   :  { %s33_s28 = sshll.u32 %s2228_s27, 4  ;;  %s2229_s9 = smov 128   ;;  %s34_s28 = int_to_ptr.vmem [resolvable:$true] %s33_s28 }
   0x5   :  { %s2230_s10 = smov 8   ;;  %s2231_s11 = smov [#allocation8]  }
   0x6   :  { %39 = dma.hbm_to_vmem [thread:$0]  %s32_s26, 12544, %s34_s28, [#allocation6], %s2229_s9, %s2229_s9, %s2230_s10  }
   0x7   :  { %s57_s12 = sshll.u32 %s2231_s11, 4  ;;  %s21_s15 = sshll.u32 %s2336_s0, 4  ;;  %s58_s12 = int_to_ptr.vmem [resolvable:$true] %s57_s12  ;;  %s22_s15 = int_to_ptr.hbm [resolvable:$true] %s21_s15 }
   0x8   :  { %63 = dma.hbm_to_vmem [thread:$0]  %s56_s8, 4096, %s58_s12, [#allocation9], %s2229_s9, %s2229_s9, %s2230_s10  }
   0x9   :  { %s45_s17 = sshll.u32 %s2338_s2, 4  ;;  %s2232_s18 = smov [#allocation2]   ;;  %s46_s17 = int_to_ptr.hbm [resolvable:$true] %s45_s17 }
   0xa   :  { %s23_s19 = sshll.u32 %s2232_s18, 4  ;;  %s2233_s3 = smov [#allocation7]   ;;  %s24_s19 = int_to_ptr.vmem [resolvable:$true] %s23_s19 }
   0xb   :  { %26 = dma.hbm_to_vmem [thread:$0]  %s22_s15, 896, %s24_s19, [#allocation3]  }
   0xc   :  { %s47_s20 = sshll.u32 %s2233_s3, 4  ;;  %s70_s23 = sshll.u32 %s2341_s5, 4  ;;  %s48_s20 = int_to_ptr.vmem [resolvable:$true] %s47_s20  ;;  %s71_s23 = int_to_ptr.hbm [resolvable:$true] %s70_s23 }
   0xd   :  { %50 = dma.hbm_to_vmem [thread:$0]  %s46_s17, 32, %s48_s20, [#allocation6]  }
   0xe   :  { %s2234_s0 = smov [#allocation10]   ;;  %s2235_s25 = smov 64  }
   0xf   :  { %s72_s24 = sshll.u32 %s2234_s0, 4  ;;  %s2236_s26 = smov 4   ;;  %s73_s24 = int_to_ptr.vmem [resolvable:$true] %s72_s24 }
  0x10   :  { %78 = dma.hbm_to_vmem [thread:$0]  %s71_s23, 2048, %s73_s24, [#allocation9], %s2235_s25, %s2235_s25, %s2236_s26  }
  0x11   :  { %2220 = dma.done.wait [#allocation3], 896  }
  0x12   :  { %2221 = vsyncadd [#allocation3], 4294966400 }
  0x13   :  { %2222 = dma.done.wait [#allocation6], 12576  }
  0x14   :  { %2223 = vsyncadd [#allocation6], 4294954720 }
  0x15   :  { %2224 = dma.done.wait [#allocation9], 6144  }
  0x16   :  { %2225 = vsyncadd [#allocation9], 4294961152  ;;  %v1391_v0 = vld [vmem:[#allocation5 + $0x70] sm:$0xf]  ;;  %v1934_v1 = vld [vmem:[#allocation5 + $0x74] sm:$0xf0] }
  0x17   :  { %v1519_v2 = vld [vmem:[#allocation5 + $0x170] sm:$0xf]  ;;  %v1392_v3 = vor.u32 %v1934_v1, %v1391_v0  ;;  %v1966_v4 = vld [vmem:[#allocation5 + $0x174] sm:$0xf0]  ;;  %v1383_v11 = vld [vmem:[#allocation5 + $0x60] sm:$0xf] }
  0x18   :  { %v1583_v5 = vld [vmem:[#allocation5 + $0x1f0] sm:$0xf]  ;;  %v1982_v6 = vld [vmem:[#allocation5 + $0x1f4] sm:$0xf0]  ;;  %v1520_v7 = vor.u32 %v1966_v4, %v1519_v2  ;;  %v1932_v13 = vld [vmem:[#allocation5 + $0x64] sm:$0xf0] }
  0x19   :  { %v1584_v8 = vor.u32 %v1982_v6, %v1583_v5  ;;  %v1455_v9 = vld [vmem:[#allocation5 + $0xf0] sm:$0xf]  ;;  %v1950_v10 = vld [vmem:[#allocation5 + $0xf4] sm:$0xf0]  ;;  %714 = vmatpush.bf16.msra.mxu0 %v1392_v3  ;;  %v1511_v14 = vld [vmem:[#allocation5 + $0x160] sm:$0xf]  ;;  %v1384_v16 = vor.u32 %v1932_v13, %v1383_v11 }
  0x1a   :  { %v1456_v12 = vor.u32 %v1950_v10, %v1455_v9  ;;  %v1964_v15 = vld [vmem:[#allocation5 + $0x164] sm:$0xf0]  ;;  %740 = vmatpush.bf16.msra.mxu2 %v1520_v7  ;;  %v1575_v18 = vld [vmem:[#allocation5 + $0x1e0] sm:$0xf]  ;;  %v1375_v23 = vld [vmem:[#allocation5 + $0x50] sm:$0xf] }
  0x1b   :  { %753 = vmatpush.bf16.msra.mxu3 %v1584_v8  ;;  %v1512_v17 = vor.u32 %v1964_v15, %v1511_v14  ;;  %v1980_v19 = vld [vmem:[#allocation5 + $0x1e4] sm:$0xf0]  ;;  %v1447_v20 = vld [vmem:[#allocation5 + $0xe0] sm:$0xf]  ;;  %v1930_v24 = vld [vmem:[#allocation5 + $0x54] sm:$0xf0] }
  0x1c   :  { %727 = vmatpush.bf16.msra.mxu1 %v1456_v12  ;;  %v1576_v21 = vor.u32 %v1980_v19, %v1575_v18  ;;  %v1948_v22 = vld [vmem:[#allocation5 + $0xe4] sm:$0xf0]  ;;  %v1503_v26 = vld [vmem:[#allocation5 + $0x150] sm:$0xf]  ;;  %v1962_v27 = vld [vmem:[#allocation5 + $0x154] sm:$0xf0]  ;;  %v1376_v29 = vor.u32 %v1930_v24, %v1375_v23 }
  0x1d   :  { %v1448_v25 = vor.u32 %v1948_v22, %v1447_v20  ;;  %v1567_v28 = vld [vmem:[#allocation5 + $0x1d0] sm:$0xf]  ;;  %715 = vmatpush.bf16.msra.mxu0 %v1384_v16  ;;  %v1978_v30 = vld [vmem:[#allocation5 + $0x1d4] sm:$0xf0]  ;;  %v1504_v33 = vor.u32 %v1962_v27, %v1503_v26  ;;  %v1367_v35 = vld [vmem:[#allocation5 + $0x40] sm:$0xf] }
  0x1e   :  { %v1439_v31 = vld [vmem:[#allocation5 + $0xd0] sm:$0xf]  ;;  %v1946_v32 = vld [vmem:[#allocation5 + $0xd4] sm:$0xf0]  ;;  %741 = vmatpush.bf16.msra.mxu2 %v1512_v17  ;;  %v1568_v34 = vor.u32 %v1978_v30, %v1567_v28  ;;  %v1928_v36 = vld [vmem:[#allocation5 + $0x44] sm:$0xf0] }
  0x1f   :  { %754 = vmatpush.bf16.msra.mxu3 %v1576_v21  ;;  %v1495_v37 = vld [vmem:[#allocation5 + $0x140] sm:$0xf]  ;;  %v1440_v38 = vor.u32 %v1946_v32, %v1439_v31  ;;  %v1960_v39 = vld [vmem:[#allocation5 + $0x144] sm:$0xf0]  ;;  %v1368_v44 = vor.u32 %v1928_v36, %v1367_v35  ;;  %v1359_v47 = vld [vmem:[#allocation5 + $0x30] sm:$0xf] }
  0x20   :  { %728 = vmatpush.bf16.msra.mxu1 %v1448_v25  ;;  %v1559_v40 = vld [vmem:[#allocation5 + $0x1c0] sm:$0xf]  ;;  %v1976_v41 = vld [vmem:[#allocation5 + $0x1c4] sm:$0xf0]  ;;  %v1496_v45 = vor.u32 %v1960_v39, %v1495_v37  ;;  %v1926_v48 = vld [vmem:[#allocation5 + $0x34] sm:$0xf0] }
  0x21   :  { %v1431_v42 = vld [vmem:[#allocation5 + $0xc0] sm:$0xf]  ;;  %v1944_v43 = vld [vmem:[#allocation5 + $0xc4] sm:$0xf0]  ;;  %716 = vmatpush.bf16.msra.mxu0 %v1376_v29  ;;  %v1560_v46 = vor.u32 %v1976_v41, %v1559_v40  ;;  %v1487_v49 = vld [vmem:[#allocation5 + $0x130] sm:$0xf]  ;;  %v1360_v56 = vor.u32 %v1926_v48, %v1359_v47 }
  0x22   :  { %742 = vmatpush.bf16.msra.mxu2 %v1504_v33  ;;  %v1432_v50 = vor.u32 %v1944_v43, %v1431_v42  ;;  %v1958_v51 = vld [vmem:[#allocation5 + $0x134] sm:$0xf0]  ;;  %v1551_v52 = vld [vmem:[#allocation5 + $0x1b0] sm:$0xf]  ;;  %v1351_v59 = vld [vmem:[#allocation5 + $0x20] sm:$0xf] }
  0x23   :  { %755 = vmatpush.bf16.msra.mxu3 %v1568_v34  ;;  %v1974_v53 = vld [vmem:[#allocation5 + $0x1b4] sm:$0xf0]  ;;  %v1423_v54 = vld [vmem:[#allocation5 + $0xb0] sm:$0xf]  ;;  %v1488_v57 = vor.u32 %v1958_v51, %v1487_v49  ;;  %v1924_v60 = vld [vmem:[#allocation5 + $0x24] sm:$0xf0] }
  0x24   :  { %729 = vmatpush.bf16.msra.mxu1 %v1440_v38  ;;  %v1942_v55 = vld [vmem:[#allocation5 + $0xb4] sm:$0xf0]  ;;  %v1552_v58 = vor.u32 %v1974_v53, %v1551_v52  ;;  %v1479_v61 = vld [vmem:[#allocation5 + $0x120] sm:$0xf]  ;;  %v1956_v63 = vld [vmem:[#allocation5 + $0x124] sm:$0xf0]  ;;  %v1352_v4 = vor.u32 %v1924_v60, %v1351_v59 }
  0x25   :  { %717 = vmatpush.bf16.msra.mxu0 %v1368_v44  ;;  %v1424_v62 = vor.u32 %v1942_v55, %v1423_v54  ;;  %v1543_v0 = vld [vmem:[#allocation5 + $0x1a0] sm:$0xf]  ;;  %v1972_v1 = vld [vmem:[#allocation5 + $0x1a4] sm:$0xf0]  ;;  %v1480_v5 = vor.u32 %v1956_v63, %v1479_v61  ;;  %v1343_v7 = vld [vmem:[#allocation5 + $0x10] sm:$0xf] }
  0x26   :  { %743 = vmatpush.bf16.msra.mxu2 %v1496_v45  ;;  %v1415_v2 = vld [vmem:[#allocation5 + $0xa0] sm:$0xf]  ;;  %v1940_v3 = vld [vmem:[#allocation5 + $0xa4] sm:$0xf0]  ;;  %v1544_v6 = vor.u32 %v1972_v1, %v1543_v0  ;;  %v1922_v8 = vld [vmem:[#allocation5 + $0x14] sm:$0xf0] }
  0x27   :  { %756 = vmatpush.bf16.msra.mxu3 %v1560_v46  ;;  %v1471_v9 = vld [vmem:[#allocation5 + $0x110] sm:$0xf]  ;;  %v1416_v10 = vor.u32 %v1940_v3, %v1415_v2  ;;  %v1954_v11 = vld [vmem:[#allocation5 + $0x114] sm:$0xf0]  ;;  %v1344_v16 = vor.u32 %v1922_v8, %v1343_v7  ;;  %v1335_v17 = vld [vmem:[#allocation5] sm:$0xf] }
  0x28   :  { %730 = vmatpush.bf16.msra.mxu1 %v1432_v50  ;;  %v1535_v12 = vld [vmem:[#allocation5 + $0x190] sm:$0xf]  ;;  %v1970_v13 = vld [vmem:[#allocation5 + $0x194] sm:$0xf0]  ;;  %v1920_v18 = vld [vmem:[#allocation5 + $0x4] sm:$0xf0]  ;;  %v1472_v20 = vor.u32 %v1954_v11, %v1471_v9 }
  0x29   :  { %718 = vmatpush.bf16.msra.mxu0 %v1360_v56  ;;  %v1407_v14 = vld [vmem:[#allocation5 + $0x90] sm:$0xf]  ;;  %v1938_v15 = vld [vmem:[#allocation5 + $0x94] sm:$0xf0]  ;;  %v1463_v19 = vld [vmem:[#allocation5 + $0x100] sm:$0xf]  ;;  %v1536_v21 = vor.u32 %v1970_v13, %v1535_v12  ;;  %v1336_v32 = vor.u32 %v1920_v18, %v1335_v17 }
  0x2a   :  { %744 = vmatpush.bf16.msra.mxu2 %v1488_v57  ;;  %v1952_v22 = vld [vmem:[#allocation5 + $0x104] sm:$0xf0]  ;;  %v1527_v23 = vld [vmem:[#allocation5 + $0x180] sm:$0xf]  ;;  %v1408_v25 = vor.u32 %v1938_v15, %v1407_v14  ;;  %v1647_v26 = vld [vmem:[#allocation5 + $0x270] sm:$0xf] }
  0x2b   :  { %757 = vmatpush.bf16.msra.mxu3 %v1552_v58  ;;  %v1968_v24 = vld [vmem:[#allocation5 + $0x184] sm:$0xf0]  ;;  %v1998_v27 = vld [vmem:[#allocation5 + $0x274] sm:$0xf0]  ;;  %v1933_v28 = vld [vmem:[#allocation5 + $0x74] sm:$0xf]  ;;  %v1464_v36 = vor.u32 %v1952_v22, %v1463_v19 }
  0x2c   :  { %731 = vmatpush.bf16.msra.mxu1 %v1424_v62  ;;  %v1393_v29 = vld [vmem:[#allocation5 + $0x78] sm:$0xf0]  ;;  %v1399_v30 = vld [vmem:[#allocation5 + $0x80] sm:$0xf]  ;;  %v1936_v31 = vld [vmem:[#allocation5 + $0x84] sm:$0xf0]  ;;  %v1528_v37 = vor.u32 %v1968_v24, %v1527_v23  ;;  %v1648_v41 = vor.u32 %v1998_v27, %v1647_v26 }
  0x2d   :  { %719 = vmatpush.bf16.msra.mxu0 %v1352_v4  ;;  %v104_v33 = vld [vmem:[#allocation2 + $0x10] sm:$0xff]  ;;  %v1719_v34 = vld [vmem:[#allocation5 + $0x300] sm:$0xf]  ;;  %v2016_v35 = vld [vmem:[#allocation5 + $0x304] sm:$0xf0]  ;;  %v1396_v42 = vor.u32 %v1933_v28, %v1393_v29  ;;  %v1400_v46 = vor.u32 %v1936_v31, %v1399_v30  ;;  %vm710_vm0 = vcmask 130048  }
  0x2e   :  { %745 = vmatpush.bf16.msra.mxu2 %v1480_v5  ;;  %v1711_v38 = vld [vmem:[#allocation5 + $0x2f0] sm:$0xf]  ;;  %v2014_v39 = vld [vmem:[#allocation5 + $0x2f4] sm:$0xf0]  ;;  %v1949_v40 = vld [vmem:[#allocation5 + $0xf4] sm:$0xf]  ;;  %v1720_v47 = vor.u32 %v2016_v35, %v1719_v34  ;;  %v2293_v51 = vpack.c.bf16 %v104_v33, %v104_v33 }
  0x2f   :  { %758 = vmatpush.bf16.msra.mxu3 %v1544_v6  ;;  %v1457_v43 = vld [vmem:[#allocation5 + $0xf8] sm:$0xf0]  ;;  %v1639_v44 = vld [vmem:[#allocation5 + $0x260] sm:$0xf]  ;;  %v102_v45 = vld [vmem:[#allocation2] sm:$0xff]  ;;  %v1712_v52 = vor.u32 %v2014_v39, %v1711_v38  ;;  %s1321_s9 = sshll.u32 %s2343_s7, 4  ;;  %s1322_s9 = int_to_ptr.hbm [resolvable:$true] %s1321_s9 }
  0x30   :  { %732 = vmatpush.bf16.msra.mxu1 %v1416_v10  ;;  %v1996_v48 = vld [vmem:[#allocation5 + $0x264] sm:$0xf0]  ;;  %v1931_v49 = vld [vmem:[#allocation5 + $0x64] sm:$0xf]  ;;  %v1385_v50 = vld [vmem:[#allocation5 + $0x68] sm:$0xf0]  ;;  %v1460_v55 = vor.u32 %v1949_v40, %v1457_v43  ;;  %v2295_v58 = vpack.c.bf16 %v102_v45, %v102_v45 }
  0x31   :  { %720 = vmatpush.bf16.msra.mxu0 %v1344_v16  ;;  %v105_v53 = vld [vmem:[#allocation2 + $0x18] sm:$0xff]  ;;  %v103_v54 = vld [vmem:[#allocation2 + $0x8] sm:$0xff]  ;;  %v2012_v57 = vld [vmem:[#allocation5 + $0x2e4] sm:$0xf0]  ;;  %v1640_v59 = vor.u32 %v1996_v48, %v1639_v44  ;;  %v1388_v60 = vor.u32 %v1931_v49, %v1385_v50 }
  0x32   :  { %746 = vmatpush.bf16.msra.mxu2 %v1472_v20  ;;  %v1703_v56 = vld [vmem:[#allocation5 + $0x2e0] sm:$0xf]  ;;  %v1947_v61 = vld [vmem:[#allocation5 + $0xe4] sm:$0xf]  ;;  %v1449_v62 = vld [vmem:[#allocation5 + $0xe8] sm:$0xf0]  ;;  %v2297_v3 = vpack.c.bf16 %v105_v53, %v105_v53  ;;  %v2299_v4 = vpack.c.bf16 %v103_v54, %v103_v54 }
  0x33   :  { %759 = vmatpush.bf16.msra.mxu3 %v1536_v21  ;;  %v1631_v63 = vld [vmem:[#allocation5 + $0x250] sm:$0xf]  ;;  %v1994_v0 = vld [vmem:[#allocation5 + $0x254] sm:$0xf0]  ;;  %v1929_v1 = vld [vmem:[#allocation5 + $0x54] sm:$0xf]  ;;  %v1704_v5 = vor.u32 %v2012_v57, %v1703_v56  ;;  %v1452_v6 = vor.u32 %v1947_v61, %v1449_v62 }
  0x34   :  { %733 = vmatpush.bf16.msra.mxu1 %v1408_v25  ;;  %v1377_v2 = vld [vmem:[#allocation5 + $0x58] sm:$0xf0]  ;;  %v1695_v7 = vld [vmem:[#allocation5 + $0x2d0] sm:$0xf]  ;;  %v2010_v8 = vld [vmem:[#allocation5 + $0x2d4] sm:$0xf0]  ;;  %v1632_v9 = vor.u32 %v1994_v0, %v1631_v63 }
  0x35   :  { %721 = vmatpush.bf16.msra.mxu0 %v1336_v32  ;;  %v1380_v10 = vor.u32 %v1929_v1, %v1377_v2  ;;  %v1945_v11 = vld [vmem:[#allocation5 + $0xd4] sm:$0xf]  ;;  %v1441_v12 = vld [vmem:[#allocation5 + $0xd8] sm:$0xf0]  ;;  %v1623_v13 = vld [vmem:[#allocation5 + $0x240] sm:$0xf]  ;;  %v1696_v17 = vor.u32 %v2010_v8, %v1695_v7 }
  0x36   :  { %747 = vmatpush.bf16.msra.mxu2 %v1464_v36  ;;  %v1992_v14 = vld [vmem:[#allocation5 + $0x244] sm:$0xf0]  ;;  %v1927_v15 = vld [vmem:[#allocation5 + $0x44] sm:$0xf]  ;;  %v1369_v16 = vld [vmem:[#allocation5 + $0x48] sm:$0xf0]  ;;  %v1444_v18 = vor.u32 %v1945_v11, %v1441_v12 }
  0x37   :  { %760 = vmatpush.bf16.msra.mxu3 %v1528_v37  ;;  %v1687_v19 = vld [vmem:[#allocation5 + $0x2c0] sm:$0xf]  ;;  %v2008_v20 = vld [vmem:[#allocation5 + $0x2c4] sm:$0xf0]  ;;  %v1624_v21 = vor.u32 %v1992_v14, %v1623_v13  ;;  %v1372_v22 = vor.u32 %v1927_v15, %v1369_v16  ;;  %v1943_v23 = vld [vmem:[#allocation5 + $0xc4] sm:$0xf] }
  0x38   :  { %734 = vmatpush.bf16.msra.mxu1 %v1400_v46  ;;  %722 = vmatmul.bf16.vlgmr.msra.gmra.mxu0 %v2295_v58  ;;  %v1433_v24 = vld [vmem:[#allocation5 + $0xc8] sm:$0xf0]  ;;  %v1615_v25 = vld [vmem:[#allocation5 + $0x230] sm:$0xf]  ;;  %v1990_v26 = vld [vmem:[#allocation5 + $0x234] sm:$0xf0]  ;;  %v1688_v29 = vor.u32 %v2008_v20, %v1687_v19 }
  0x39   :  { %766 = vmatpush.bf16.msrb.mxu0 %v1648_v41  ;;  %748 = vmatmul.bf16.vlgmr.msra.gmra.mxu2 %v2293_v51  ;;  %v1925_v27 = vld [vmem:[#allocation5 + $0x34] sm:$0xf]  ;;  %v1361_v28 = vld [vmem:[#allocation5 + $0x38] sm:$0xf0]  ;;  %v1436_v30 = vor.u32 %v1943_v23, %v1433_v24  ;;  %v1679_v31 = vld [vmem:[#allocation5 + $0x2b0] sm:$0xf]  ;;  %v1616_v34 = vor.u32 %v1990_v26, %v1615_v25 }
  0x3a   :  { %799 = vmatpush.bf16.msrb.mxu2 %v1720_v47  ;;  %761 = vmatmul.bf16.vlgmr.msra.gmra.mxu3 %v2297_v3  ;;  %v2006_v32 = vld [vmem:[#allocation5 + $0x2b4] sm:$0xf0]  ;;  %v1364_v35 = vor.u32 %v1925_v27, %v1361_v28  ;;  %v1941_v36 = vld [vmem:[#allocation5 + $0xb4] sm:$0xf]  ;;  %v1425_v37 = vld [vmem:[#allocation5 + $0xb8] sm:$0xf0] }
  0x3b   :  { %805 = vmatpush.bf16.msrb.mxu3 %v1396_v42  ;;  %735 = vmatmul.bf16.vlgmr.msra.gmra.mxu1 %v2299_v4  ;;  %v108_v33 = vld [vmem:[#allocation2 + $0x30] sm:$0xff]  ;;  %v1607_v38 = vld [vmem:[#allocation5 + $0x220] sm:$0xf]  ;;  %v1988_v39 = vld [vmem:[#allocation5 + $0x224] sm:$0xf0]  ;;  %v1680_v42 = vor.u32 %v2006_v32, %v1679_v31  ;;  %v1428_v44 = vor.u32 %v1941_v36, %v1425_v37 }
  0x3c   :  { %779 = vmatpush.bf16.msrb.mxu1 %v1712_v52  ;;  %v1923_v40 = vld [vmem:[#allocation5 + $0x24] sm:$0xf]  ;;  %v1353_v41 = vld [vmem:[#allocation5 + $0x28] sm:$0xf0]  ;;  %v2305_v43 = vpack.c.bf16 %v108_v33, %v108_v33  ;;  %v1671_v45 = vld [vmem:[#allocation5 + $0x2a0] sm:$0xf]  ;;  %v1608_v47 = vor.u32 %v1988_v39, %v1607_v38 }
  0x3d   :  { %767 = vmatpush.bf16.msrb.mxu0 %v1640_v59  ;;  %v2004_v46 = vld [vmem:[#allocation5 + $0x2a4] sm:$0xf0]  ;;  %v1356_v48 = vor.u32 %v1923_v40, %v1353_v41  ;;  %v1939_v49 = vld [vmem:[#allocation5 + $0xa4] sm:$0xf]  ;;  %v1417_v50 = vld [vmem:[#allocation5 + $0xa8] sm:$0xf0] }
  0x3e   :  { %818 = vmatpush.bf16.msra.mxu2 %v1460_v55  ;;  %v1599_v52 = vld [vmem:[#allocation5 + $0x210] sm:$0xf]  ;;  %v1986_v53 = vld [vmem:[#allocation5 + $0x214] sm:$0xf0]  ;;  %v1921_v54 = vld [vmem:[#allocation5 + $0x14] sm:$0xf]  ;;  %v1672_v56 = vor.u32 %v2004_v46, %v1671_v45  ;;  %v1420_v57 = vor.u32 %v1939_v49, %v1417_v50 }
  0x3f   :  { %806 = vmatpush.bf16.msrb.mxu3 %v1388_v60  ;;  %v1345_v55 = vld [vmem:[#allocation5 + $0x18] sm:$0xf0]  ;;  %v1663_v59 = vld [vmem:[#allocation5 + $0x290] sm:$0xf]  ;;  %v2002_v60 = vld [vmem:[#allocation5 + $0x294] sm:$0xf0]  ;;  %v1600_v62 = vor.u32 %v1986_v53, %v1599_v52 }
  0x40   :  { %780 = vmatpush.bf16.msrb.mxu1 %v1704_v5  ;;  %v1937_v61 = vld [vmem:[#allocation5 + $0x94] sm:$0xf]  ;;  %v1348_v63 = vor.u32 %v1921_v54, %v1345_v55  ;;  %v1409_v0 = vld [vmem:[#allocation5 + $0x98] sm:$0xf0]  ;;  %v1591_v1 = vld [vmem:[#allocation5 + $0x200] sm:$0xf]  ;;  %v1664_v8 = vor.u32 %v2002_v60, %v1663_v59 }
  0x41   :  { %768 = vmatpush.bf16.msrb.mxu0 %v1632_v9  ;;  %v1984_v2 = vld [vmem:[#allocation5 + $0x204] sm:$0xf0]  ;;  %v1919_v5 = vld [vmem:[#allocation5 + $0x4] sm:$0xf]  ;;  %v1965_v7 = vld [vmem:[#allocation5 + $0x174] sm:$0xf]  ;;  %v1412_v12 = vor.u32 %v1937_v61, %v1409_v0 }
  0x42   :  { %819 = vmatpush.bf16.msra.mxu2 %v1452_v6  ;;  %v1337_v6 = vld [vmem:[#allocation5 + $0x8] sm:$0xf0]  ;;  %v1521_v9 = vld [vmem:[#allocation5 + $0x178] sm:$0xf0]  ;;  %v1655_v13 = vld [vmem:[#allocation5 + $0x280] sm:$0xf]  ;;  %v1592_v16 = vor.u32 %v1984_v2, %v1591_v1 }
  0x43   :  { %807 = vmatpush.bf16.msrb.mxu3 %v1380_v10  ;;  %v1997_v10 = vld [vmem:[#allocation5 + $0x274] sm:$0xf]  ;;  %v1649_v11 = vld [vmem:[#allocation5 + $0x278] sm:$0xf0]  ;;  %v2000_v14 = vld [vmem:[#allocation5 + $0x284] sm:$0xf0] }
  0x44   :  { %781 = vmatpush.bf16.msrb.mxu1 %v1696_v17  ;;  %v106_v15 = vld [vmem:[#allocation2 + $0x20] sm:$0xff]  ;;  %v1340_v17 = vor.u32 %v1919_v5, %v1337_v6  ;;  %v1981_v20 = vld [vmem:[#allocation5 + $0x1f4] sm:$0xf]  ;;  %v1585_v23 = vld [vmem:[#allocation5 + $0x1f8] sm:$0xf0]  ;;  %v1656_v26 = vor.u32 %v2000_v14, %v1655_v13 }
  0x45   :  { %769 = vmatpush.bf16.msrb.mxu0 %v1624_v21  ;;  %v1401_v19 = vld [vmem:[#allocation5 + $0x88] sm:$0xf0]  ;;  %v1524_v21 = vor.u32 %v1965_v7, %v1521_v9  ;;  %v2013_v24 = vld [vmem:[#allocation5 + $0x2f4] sm:$0xf]  ;;  %v1713_v25 = vld [vmem:[#allocation5 + $0x2f8] sm:$0xf0] }
  0x46   :  { %820 = vmatpush.bf16.msra.mxu2 %v1444_v18  ;;  %v1935_v18 = vld [vmem:[#allocation5 + $0x84] sm:$0xf]  ;;  %v107_v27 = vld [vmem:[#allocation2 + $0x28] sm:$0xff]  ;;  %v1641_v33 = vld [vmem:[#allocation5 + $0x268] sm:$0xf0] }
  0x47   :  { %808 = vmatpush.bf16.msrb.mxu3 %v1372_v22  ;;  %v1652_v22 = vor.u32 %v1997_v10, %v1649_v11  ;;  %v1963_v28 = vld [vmem:[#allocation5 + $0x164] sm:$0xf]  ;;  %v1404_v31 = vor.u32 %v1935_v18, %v1401_v19  ;;  %v2311_v37 = vpack.c.bf16 %v107_v27, %v107_v27  ;;  %v1577_v39 = vld [vmem:[#allocation5 + $0x1e8] sm:$0xf0]  ;;  %v1505_v45 = vld [vmem:[#allocation5 + $0x158] sm:$0xf0] }
  0x48   :  { %782 = vmatpush.bf16.msrb.mxu1 %v1688_v29  ;;  %v1513_v29 = vld [vmem:[#allocation5 + $0x168] sm:$0xf0]  ;;  %v1995_v32 = vld [vmem:[#allocation5 + $0x264] sm:$0xf]  ;;  %v1993_v46 = vld [vmem:[#allocation5 + $0x254] sm:$0xf] }
  0x49   :  { %770 = vmatpush.bf16.msrb.mxu0 %v1616_v34  ;;  %1725 = vmatmul.msk.bf16.vlgmr.msrb.gmra.mxu2 %vm710_vm0, %v2305_v43  ;;  %v1588_v34 = vor.u32 %v1981_v20, %v1585_v23  ;;  %v1979_v36 = vld [vmem:[#allocation5 + $0x1e4] sm:$0xf]  ;;  %v1516_v38 = vor.u32 %v1963_v28, %v1513_v29  ;;  %v1705_v41 = vld [vmem:[#allocation5 + $0x2e8] sm:$0xf0]  ;;  %v1977_v50 = vld [vmem:[#allocation5 + $0x1d4] sm:$0xf] }
  0x4a   :  { %821 = vmatpush.bf16.msra.mxu2 %v1436_v30  ;;  %v2309_v30 = vpack.c.bf16 %v106_v15, %v106_v15  ;;  %v2011_v40 = vld [vmem:[#allocation5 + $0x2e4] sm:$0xf]  ;;  %v1569_v53 = vld [vmem:[#allocation5 + $0x1d8] sm:$0xf0]  ;;  %v2009_v54 = vld [vmem:[#allocation5 + $0x2d4] sm:$0xf] }
  0x4b   :  { %809 = vmatpush.bf16.msrb.mxu3 %v1364_v35  ;;  %v1716_v35 = vor.u32 %v2013_v24, %v1713_v25  ;;  %v1708_v49 = vor.u32 %v2011_v40, %v1705_v41  ;;  %v1697_v55 = vld [vmem:[#allocation5 + $0x2d8] sm:$0xf0]  ;;  %v1497_v59 = vld [vmem:[#allocation5 + $0x148] sm:$0xf0]  ;;  %v1991_v60 = vld [vmem:[#allocation5 + $0x244] sm:$0xf] }
  0x4c   :  { %783 = vmatpush.bf16.msrb.mxu1 %v1680_v42  ;;  %v1644_v42 = vor.u32 %v1995_v32, %v1641_v33  ;;  %v1625_v61 = vld [vmem:[#allocation5 + $0x248] sm:$0xf0]  ;;  %v1975_v0 = vld [vmem:[#allocation5 + $0x1c4] sm:$0xf]  ;;  %v1489_v9 = vld [vmem:[#allocation5 + $0x138] sm:$0xf0] }
  0x4d   :  { %771 = vmatpush.bf16.msrb.mxu0 %v1608_v47  ;;  %v1633_v47 = vld [vmem:[#allocation5 + $0x258] sm:$0xf0]  ;;  %v1561_v2 = vld [vmem:[#allocation5 + $0x1c8] sm:$0xf0]  ;;  %v2007_v5 = vld [vmem:[#allocation5 + $0x2c4] sm:$0xf]  ;;  %v1628_v7 = vor.u32 %v1991_v60, %v1625_v61 }
  0x4e   :  { %822 = vmatpush.bf16.msra.mxu2 %v1428_v44  ;;  %v1961_v44 = vld [vmem:[#allocation5 + $0x154] sm:$0xf]  ;;  %v1689_v6 = vld [vmem:[#allocation5 + $0x2c8] sm:$0xf0]  ;;  %v1564_v11 = vor.u32 %v1975_v0, %v1561_v2  ;;  %v1553_v14 = vld [vmem:[#allocation5 + $0x1b8] sm:$0xf0] }
  0x4f   :  { %810 = vmatpush.bf16.msrb.mxu3 %v1356_v48  ;;  %v1580_v48 = vor.u32 %v1979_v36, %v1577_v39  ;;  %v1508_v52 = vor.u32 %v1961_v44, %v1505_v45  ;;  %v1989_v10 = vld [vmem:[#allocation5 + $0x234] sm:$0xf]  ;;  %v1955_v18 = vld [vmem:[#allocation5 + $0x124] sm:$0xf]  ;;  %v1481_v19 = vld [vmem:[#allocation5 + $0x128] sm:$0xf0] }
  0x50   :  { %784 = vmatpush.bf16.msrb.mxu1 %v1672_v56  ;;  %v1636_v56 = vor.u32 %v1993_v46, %v1633_v47  ;;  %v2005_v15 = vld [vmem:[#allocation5 + $0x2b4] sm:$0xf]  ;;  %v1987_v20 = vld [vmem:[#allocation5 + $0x224] sm:$0xf]  ;;  %v1484_v25 = vor.u32 %v1955_v18, %v1481_v19  ;;  %v1673_v28 = vld [vmem:[#allocation5 + $0x2a8] sm:$0xf0] }
  0x51   :  { %772 = vmatpush.bf16.msrb.mxu0 %v1600_v62  ;;  %v1572_v62 = vor.u32 %v1977_v50, %v1569_v53  ;;  %v1971_v24 = vld [vmem:[#allocation5 + $0x1a4] sm:$0xf]  ;;  %v1473_v32 = vld [vmem:[#allocation5 + $0x118] sm:$0xf0]  ;;  %v1985_v33 = vld [vmem:[#allocation5 + $0x214] sm:$0xf] }
  0x52   :  { %823 = vmatpush.bf16.msra.mxu2 %v1420_v57  ;;  %v1959_v57 = vld [vmem:[#allocation5 + $0x144] sm:$0xf]  ;;  %v1537_v40 = vld [vmem:[#allocation5 + $0x198] sm:$0xf0]  ;;  %v2001_v41 = vld [vmem:[#allocation5 + $0x294] sm:$0xf] }
  0x53   :  { %811 = vmatpush.bf16.msrb.mxu3 %v1348_v63  ;;  %v1700_v63 = vor.u32 %v2009_v54, %v1697_v55  ;;  %v1500_v1 = vor.u32 %v1959_v57, %v1497_v59  ;;  %v2003_v27 = vld [vmem:[#allocation5 + $0x2a4] sm:$0xf]  ;;  %v1465_v46 = vld [vmem:[#allocation5 + $0x108] sm:$0xf0] }
  0x54   :  { %785 = vmatpush.bf16.msrb.mxu1 %v1664_v8  ;;  %v1957_v8 = vld [vmem:[#allocation5 + $0x134] sm:$0xf]  ;;  %v1676_v36 = vor.u32 %v2003_v27, %v1673_v28  ;;  %v1951_v45 = vld [vmem:[#allocation5 + $0x104] sm:$0xf]  ;;  %v1721_v50 = vld [vmem:[#allocation5 + $0x308] sm:$0xf0] }
  0x55   :  { %773 = vmatpush.bf16.msrb.mxu0 %v1592_v16  ;;  %v1492_v13 = vor.u32 %v1957_v8, %v1489_v9  ;;  %v1681_v16 = vld [vmem:[#allocation5 + $0x2b8] sm:$0xf0]  ;;  %v1983_v47 = vld [vmem:[#allocation5 + $0x204] sm:$0xf]  ;;  %v1468_v54 = vor.u32 %v1951_v45, %v1465_v46  ;;  %v1657_v60 = vld [vmem:[#allocation5 + $0x288] sm:$0xf0] }
  0x56   :  { %824 = vmatpush.bf16.msra.mxu2 %v1412_v12  ;;  %v1973_v12 = vld [vmem:[#allocation5 + $0x1b4] sm:$0xf]  ;;  %v1684_v23 = vor.u32 %v2005_v15, %v1681_v16  ;;  %v1967_v55 = vld [vmem:[#allocation5 + $0x184] sm:$0xf]  ;;  %v2030_v9 = vld [vmem:[#allocation8 + $0x64] sm:$0xf0] }
  0x57   :  { %812 = vmatpush.bf16.msrb.mxu3 %v1340_v17  ;;  %v1999_v59 = vld [vmem:[#allocation5 + $0x284] sm:$0xf]  ;;  %v1777_v8 = vld [vmem:[#allocation8 + $0x60] sm:$0xf]  ;;  %v2025_v15 = vld [vmem:[#allocation8 + $0x44] sm:$0xf] }
  0x58   :  { %786 = vmatpush.bf16.msrb.mxu1 %v1656_v26  ;;  %774 = vmatmul.bf16.vlgmr.msrb.gmra.mxu0 %v2309_v30  ;;  %v1545_v26 = vld [vmem:[#allocation5 + $0x1a8] sm:$0xf0]  ;;  %v1785_v0 = vld [vmem:[#allocation8 + $0x70] sm:$0xf]  ;;  %v1763_v16 = vld [vmem:[#allocation8 + $0x48] sm:$0xf0] }
  0x59   :  { %831 = vmatpush.bf16.msra.mxu0 %v1524_v21  ;;  %v1609_v21 = vld [vmem:[#allocation5 + $0x228] sm:$0xf0]  ;;  %v1766_v18 = vor.u32 %v2025_v15, %v1763_v16  ;;  %v1753_v19 = vld [vmem:[#allocation8 + $0x30] sm:$0xf]  ;;  %v2021_v27 = vld [vmem:[#allocation8 + $0x24] sm:$0xf] }
  0x5a   :  { %825 = vmatpush.bf16.msra.mxu2 %v1404_v31  ;;  %813 = vmatmul.bf16.vlgmr.msrb.gmra.mxu3 %v2295_v58  ;;  %v1692_v58 = vor.u32 %v2007_v5, %v1689_v6  ;;  %v1612_v29 = vor.u32 %v1987_v20, %v1609_v21  ;;  %v1953_v31 = vld [vmem:[#allocation5 + $0x114] sm:$0xf]  ;;  %v2031_v5 = vld [vmem:[#allocation8 + $0x74] sm:$0xf]  ;;  %v1787_v6 = vld [vmem:[#allocation8 + $0x78] sm:$0xf0] }
  0x5b   :  { %857 = vmatpush.bf16.msra.mxu3 %v1652_v22  ;;  %787 = vmatmul.bf16.vlgmr.msrb.gmra.mxu1 %v2311_v37  ;;  %v1556_v22 = vor.u32 %v1973_v12, %v1553_v14  ;;  %v1476_v39 = vor.u32 %v1953_v31, %v1473_v32  ;;  %v1761_v12 = vld [vmem:[#allocation8 + $0x40] sm:$0xf]  ;;  %v2024_v20 = vld [vmem:[#allocation8 + $0x34] sm:$0xf0]  ;;  %v2023_v21 = vld [vmem:[#allocation8 + $0x34] sm:$0xf] }
  0x5c   :  { %844 = vmatpush.bf16.msra.mxu1 %v1588_v34  ;;  %v1601_v34 = vld [vmem:[#allocation5 + $0x218] sm:$0xf0]  ;;  %v1737_v32 = vld [vmem:[#allocation8 + $0x10] sm:$0xf] }
  0x5d   :  { %832 = vmatpush.bf16.msra.mxu0 %v1516_v38  ;;  %826 = vmatmul.bf16.vlgmr.msra.gmra.mxu2 %v2299_v4  ;;  %v1617_v4 = vld [vmem:[#allocation5 + $0x238] sm:$0xf0]  ;;  %v1969_v38 = vld [vmem:[#allocation5 + $0x194] sm:$0xf]  ;;  %v1604_v44 = vor.u32 %v1985_v33, %v1601_v34  ;;  %v2020_v33 = vld [vmem:[#allocation8 + $0x14] sm:$0xf0] }
  0x5e   :  { %870 = vmatpush.bf16.msrb.mxu2 %v1716_v35  ;;  %v1620_v17 = vor.u32 %v1989_v10, %v1617_v4  ;;  %v1548_v35 = vor.u32 %v1971_v24, %v1545_v26  ;;  %v2029_v10 = vld [vmem:[#allocation8 + $0x64] sm:$0xf]  ;;  %v2022_v26 = vld [vmem:[#allocation8 + $0x24] sm:$0xf0]  ;;  %v2019_v34 = vld [vmem:[#allocation8 + $0x14] sm:$0xf] }
  0x5f   :  { %858 = vmatpush.bf16.msra.mxu3 %v1644_v42  ;;  %v1665_v42 = vld [vmem:[#allocation5 + $0x298] sm:$0xf0] }
  0x60   :  { %845 = vmatpush.bf16.msra.mxu1 %v1580_v48  ;;  %v1593_v48 = vld [vmem:[#allocation5 + $0x208] sm:$0xf0]  ;;  %v1668_v53 = vor.u32 %v2001_v41, %v1665_v42  ;;  %v1729_v41 = vld [vmem:[#allocation8] sm:$0xf]  ;;  %v2018_v42 = vld [vmem:[#allocation8 + $0x4] sm:$0xf0] }
  0x61   :  { %833 = vmatpush.bf16.msra.mxu0 %v1508_v52  ;;  %v1540_v52 = vor.u32 %v1969_v38, %v1537_v40  ;;  %v1596_v57 = vor.u32 %v1983_v47, %v1593_v48  ;;  %v1730_v45 = vor.u32 %v2018_v42, %v1729_v41  ;;  %v1731_v46 = vld [vmem:[#allocation8 + $0x8] sm:$0xf0] }
  0x62   :  { %871 = vmatpush.bf16.msrb.mxu2 %v1708_v49  ;;  %v2015_v49 = vld [vmem:[#allocation5 + $0x304] sm:$0xf] }
  0x63   :  { %859 = vmatpush.bf16.msra.mxu3 %v1636_v56  ;;  %v1529_v56 = vld [vmem:[#allocation5 + $0x188] sm:$0xf0]  ;;  %v1724_v61 = vor.u32 %v2015_v49, %v1721_v50  ;;  %v2323_v49 = vld [vmem:[#allocation7] sm:$0x3] }
  0x64   :  { %846 = vmatpush.bf16.msra.mxu1 %v1572_v62  ;;  %v1532_v62 = vor.u32 %v1967_v55, %v1529_v56  ;;  %v2047_v55 = vld [vmem:[#allocation8 + $0xf4] sm:$0xf] }
  0x65   :  { %834 = vmatpush.bf16.msra.mxu0 %v1500_v1  ;;  %v2032_v1 = vld [vmem:[#allocation8 + $0x74] sm:$0xf0] }
  0x66   :  { %872 = vmatpush.bf16.msrb.mxu2 %v1700_v63  ;;  %v1660_v63 = vor.u32 %v1999_v59, %v1657_v60  ;;  %v1786_v2 = vor.u32 %v2032_v1, %v1785_v0  ;;  %v1851_v59 = vld [vmem:[#allocation8 + $0xf8] sm:$0xf0]  ;;  %v216_v60 = vperm.slane %v2323_v49, 0  ;;  %v2046_v0 = vld [vmem:[#allocation8 + $0xe4] sm:$0xf0] }
  0x67   :  { %860 = vmatpush.bf16.msra.mxu3 %v1628_v7  ;;  %v1790_v7 = vor.u32 %v2031_v5, %v1787_v6  ;;  %v2045_v1 = vld [vmem:[#allocation8 + $0xe4] sm:$0xf]  ;;  %v1843_v6 = vld [vmem:[#allocation8 + $0xe8] sm:$0xf0] }
  0x68   :  { %847 = vmatpush.bf16.msra.mxu1 %v1564_v11  ;;  %v2027_v11 = vld [vmem:[#allocation8 + $0x54] sm:$0xf] }
  0x69   :  { %835 = vmatpush.bf16.msra.mxu0 %v1492_v13  ;;  %v2026_v13 = vld [vmem:[#allocation8 + $0x44] sm:$0xf0] }
  0x6a   :  { %873 = vmatpush.bf16.msrb.mxu2 %v1692_v58  ;;  %v1771_v58 = vld [vmem:[#allocation8 + $0x58] sm:$0xf0] }
  0x6b   :  { %861 = vmatpush.bf16.msra.mxu3 %v1620_v17  ;;  %v1774_v14 = vor.u32 %v2027_v11, %v1771_v58  ;;  %v1762_v17 = vor.u32 %v2026_v13, %v1761_v12  ;;  %v1835_v11 = vld [vmem:[#allocation8 + $0xd8] sm:$0xf0]  ;;  %v1825_v12 = vld [vmem:[#allocation8 + $0xc0] sm:$0xf]  ;;  %v2042_v13 = vld [vmem:[#allocation8 + $0xc4] sm:$0xf0] }
  0x6c   :  { %848 = vmatpush.bf16.msra.mxu1 %v1556_v22  ;;  %v1755_v22 = vld [vmem:[#allocation8 + $0x38] sm:$0xf0]  ;;  %v1826_v16 = vor.u32 %v2042_v13, %v1825_v12 }
  0x6d   :  { %836 = vmatpush.bf16.msra.mxu0 %v1484_v25  ;;  %v1758_v24 = vor.u32 %v2023_v21, %v1755_v22  ;;  %v1745_v25 = vld [vmem:[#allocation8 + $0x20] sm:$0xf]  ;;  %v2056_v12 = vld [vmem:[#allocation10 + $0x38] sm:$0xff] }
  0x6e   :  { %874 = vmatpush.bf16.msrb.mxu2 %v1684_v23  ;;  %v1754_v23 = vor.u32 %v2024_v20, %v1753_v19  ;;  %v1746_v28 = vor.u32 %v2022_v26, %v1745_v25  ;;  %v2039_v25 = vld [vmem:[#allocation8 + $0xb4] sm:$0xf]  ;;  %v2064_v13 = vld [vmem:[#allocation10 + $0x78] sm:$0xff] }
  0x6f   :  { %862 = vmatpush.bf16.msra.mxu3 %v1612_v29  ;;  %v1747_v29 = vld [vmem:[#allocation8 + $0x28] sm:$0xf0] }
  0x70   :  { %849 = vmatpush.bf16.msra.mxu1 %v1548_v35  ;;  %v1750_v31 = vor.u32 %v2021_v27, %v1747_v29  ;;  %v1738_v35 = vor.u32 %v2020_v33, %v1737_v32  ;;  %v1819_v27 = vld [vmem:[#allocation8 + $0xb8] sm:$0xf0]  ;;  %v1809_v32 = vld [vmem:[#allocation8 + $0xa0] sm:$0xf]  ;;  %v2038_v33 = vld [vmem:[#allocation8 + $0xa4] sm:$0xf0] }
  0x71   :  { %837 = vmatpush.bf16.msra.mxu0 %v1476_v39  ;;  %v1822_v29 = vor.u32 %v2039_v25, %v1819_v27 }
  0x72   :  { %875 = vmatpush.bf16.msrb.mxu2 %v1676_v36  ;;  %v1739_v36 = vld [vmem:[#allocation8 + $0x18] sm:$0xf0] }
  0x73   :  { %863 = vmatpush.bf16.msra.mxu3 %v1604_v44  ;;  %v1742_v39 = vor.u32 %v2019_v34, %v1739_v36  ;;  %v2017_v44 = vld [vmem:[#allocation8 + $0x4] sm:$0xf] }
  0x74   :  { %850 = vmatpush.bf16.msra.mxu1 %v1540_v52  ;;  %v1734_v47 = vor.u32 %v2017_v44, %v1731_v46  ;;  %v2037_v36 = vld [vmem:[#allocation8 + $0xa4] sm:$0xf]  ;;  %v2036_v46 = vld [vmem:[#allocation8 + $0x94] sm:$0xf0] }
  0x75   :  { %838 = vmatpush.bf16.msra.mxu0 %v1468_v54  ;;  %v2048_v54 = vld [vmem:[#allocation8 + $0xf4] sm:$0xf0] }
  0x76   :  { %876 = vmatpush.bf16.msrb.mxu2 %v1668_v53  ;;  %v1849_v53 = vld [vmem:[#allocation8 + $0xf0] sm:$0xf] }
  0x77   :  { %864 = vmatpush.bf16.msra.mxu3 %v1596_v57  ;;  %v1850_v57 = vor.u32 %v2048_v54, %v1849_v53  ;;  %v1793_v53 = vld [vmem:[#allocation8 + $0x80] sm:$0xf]  ;;  %v2034_v54 = vld [vmem:[#allocation8 + $0x84] sm:$0xf0] }
  0x78   :  { %851 = vmatpush.bf16.msra.mxu1 %v1532_v62  ;;  %839 = vmatmul.bf16.vlgmr.msra.gmra.mxu0 %v2293_v51  ;;  %v1778_v51 = vor.u32 %v2030_v9, %v1777_v8  ;;  %v1846_v8 = vor.u32 %v2045_v1, %v1843_v6 }
  0x79   :  { %890 = vmatpush.bf16.msrb.mxu0 %v1724_v61  ;;  %v1854_v61 = vor.u32 %v2047_v55, %v1851_v59  ;;  %v2033_v55 = vld [vmem:[#allocation8 + $0x84] sm:$0xf] }
  0x7a   :  { %865 = vmatmul.bf16.vlgmr.msra.gmra.mxu3 %v2309_v30  ;;  %877 = vmatpush.bf16.msrb.mxu2 %v1660_v63  ;;  %v1779_v30 = vld [vmem:[#allocation8 + $0x68] sm:$0xf0]  ;;  %v1841_v63 = vld [vmem:[#allocation8 + $0xe0] sm:$0xf] }
  0x7b   :  { %852 = vmatmul.bf16.vlgmr.msra.gmra.mxu1 %v2297_v3  ;;  %v1782_v4 = vor.u32 %v2029_v10, %v1779_v30  ;;  %v1769_v3 = vld [vmem:[#allocation8 + $0x50] sm:$0xf]  ;;  %1111 = vmatpush.bf16.msrb.mxu3 %v1850_v57  ;;  %v1842_v5 = vor.u32 %v2046_v0, %v1841_v63  ;;  %v1795_v57 = vld [vmem:[#allocation8 + $0x88] sm:$0xf0] }
  0x7c   :  { %1098 = vmatpush.bf16.msrb.mxu1 %v1786_v2  ;;  %v1833_v30 = vld [vmem:[#allocation8 + $0xd0] sm:$0xf] }
  0x7d   :  { %878 = vmatmul.bf16.vlgmr.msrb.gmra.mxu2 %v2311_v37  ;;  %1124 = vmatpush.bf16.msra.mxu0 %v1790_v7  ;;  %v2028_v37 = vld [vmem:[#allocation8 + $0x54] sm:$0xf0] }
  0x7e   :  { %1137 = vmatpush.bf16.msra.mxu2 %v1854_v61 }
  0x7f   :  { %1112 = vmatpush.bf16.msrb.mxu3 %v1842_v5 }
  0x80   :  { %1099 = vmatpush.bf16.msrb.mxu1 %v1778_v51 }
  0x81   :  { %1125 = vmatpush.bf16.msra.mxu0 %v1782_v4  ;;  %v2044_v4 = vld [vmem:[#allocation8 + $0xd4] sm:$0xf0] }
  0x82   :  { %1138 = vmatpush.bf16.msra.mxu2 %v1846_v8 }
  0x85   :  { %1126 = vmatpush.bf16.msra.mxu0 %v1774_v14  ;;  %v2041_v14 = vld [vmem:[#allocation8 + $0xc4] sm:$0xf] }
  0x88   :  { %1726 = vmatmul.msk.bf16.vlgmr.msrb.gmra.mxu0 %vm710_vm0, %v2305_v43  ;;  %v1770_v43 = vor.u32 %v2028_v37, %v1769_v3  ;;  %v2043_v3 = vld [vmem:[#allocation8 + $0xd4] sm:$0xf]  ;;  %v1834_v37 = vor.u32 %v2044_v4, %v1833_v30 }
  0x89   :  { %1127 = vmatpush.bf16.msra.mxu0 %v1766_v18 }
  0x8a   :  { %1100 = vmatpush.bf16.msrb.mxu1 %v1770_v43  ;;  %v1838_v43 = vor.u32 %v2043_v3, %v1835_v11  ;;  %1113 = vmatpush.bf16.msrb.mxu3 %v1834_v37 }
  0x8c   :  { %1139 = vmatpush.bf16.msra.mxu2 %v1838_v43 }
  0x8d   :  { %1128 = vmatpush.bf16.msra.mxu0 %v1758_v24  ;;  %v2040_v24 = vld [vmem:[#allocation8 + $0xb4] sm:$0xf0] }
  0x8e   :  { %1101 = vmatpush.bf16.msrb.mxu1 %v1762_v17  ;;  %v1827_v17 = vld [vmem:[#allocation8 + $0xc8] sm:$0xf0]  ;;  %1114 = vmatpush.bf16.msrb.mxu3 %v1826_v16 }
  0x8f   :  { %v1830_v20 = vor.u32 %v2041_v14, %v1827_v17  ;;  %v2055_v14 = vld [vmem:[#allocation10 + $0x30] sm:$0xff]  ;;  %v2054_v16 = vld [vmem:[#allocation10 + $0x28] sm:$0xff] }
  0x90   :  { %v2062_v17 = vld [vmem:[#allocation10 + $0x68] sm:$0xff] }
  0x91   :  { %1129 = vmatpush.bf16.msra.mxu0 %v1750_v31  ;;  %1140 = vmatpush.bf16.msra.mxu2 %v1830_v20  ;;  %v2052_v20 = vld [vmem:[#allocation10 + $0x18] sm:$0xff] }
  0x92   :  { %1102 = vmatpush.bf16.msrb.mxu1 %v1754_v23  ;;  %v1817_v23 = vld [vmem:[#allocation8 + $0xb0] sm:$0xf] }
  0x93   :  { %v1818_v26 = vor.u32 %v2040_v24, %v1817_v23  ;;  %v2059_v23 = vld [vmem:[#allocation10 + $0x50] sm:$0xff] }
  0x95   :  { %1130 = vmatpush.bf16.msra.mxu0 %v1742_v39  ;;  %1115 = vmatpush.bf16.msrb.mxu3 %v1818_v26 }
  0x96   :  { %1103 = vmatpush.bf16.msrb.mxu1 %v1746_v28  ;;  %1141 = vmatpush.bf16.msra.mxu2 %v1822_v29  ;;  %v2058_v29 = vld [vmem:[#allocation10 + $0x48] sm:$0xff] }
  0x99   :  { %1131 = vmatpush.bf16.msra.mxu0 %v1734_v47  ;;  %v2035_v47 = vld [vmem:[#allocation8 + $0x94] sm:$0xf] }
  0x9a   :  { %1104 = vmatpush.bf16.msrb.mxu1 %v1738_v35  ;;  %v1810_v35 = vor.u32 %v2038_v33, %v1809_v32  ;;  %v2057_v32 = vld [vmem:[#allocation10 + $0x40] sm:$0xff]  ;;  %v932_v33 = vld [vmem:[%s2340_s4] sm:$0x3]  ;;  %s2237_s4 = smov [#allocation11]  }
  0x9b   :  { %s1319_s29 = sshll.u32 %s2237_s4, 4  ;;  %s1320_s29 = int_to_ptr.vmem [resolvable:$true] %s1319_s29 }
  0x9c   :  { %1116 = vmatpush.bf16.msrb.mxu3 %v1810_v35  ;;  %v935_v35 = vperm.slane %v932_v33, 1 }
  0x9e   :  { %1105 = vmatpush.bf16.msrb.mxu1 %v1730_v45  ;;  %v1801_v45 = vld [vmem:[#allocation8 + $0x90] sm:$0xf] }
  0xa2   :  { %1286 = vmatpush.bf16.msra.mxu1 %v2056_v12 }
  0xa6   :  { %1287 = vmatpush.bf16.msra.mxu1 %v2055_v14 }
  0xaa   :  { %1288 = vmatpush.bf16.msra.mxu1 %v2054_v16 }
  0xb5   :  { %v723_v38 = vpop.f32.mrf.mxu0 }
  0xb6   :  { %v724_v2 = vadd.f32 %v723_v38, %v216_v60  ;;  %v1811_v38 = vld [vmem:[#allocation8 + $0xa8] sm:$0xf0]  ;;  %v1798_v60 = vor.u32 %v2033_v55, %v1795_v57 }
  0xb7   :  { %v1814_v41 = vor.u32 %v2037_v36, %v1811_v38 }
  0xb8   :  { %v736_v40 = vpop.f32.mrf.mxu1 }
  0xb9   :  { %v737_v9 = vadd.f32 %v736_v40, %v724_v2  ;;  %1142 = vmatpush.bf16.msra.mxu2 %v1814_v41 }
  0xbc   :  { %v749_v48 = vpop.f32.mrf.mxu2 }
  0xbd   :  { %v762_v50 = vpop.f32.mrf.mxu3  ;;  %v725_v52 = vpop.f32.mrf.mxu0  ;;  %v750_v51 = vadd.f32 %v749_v48, %v737_v9  ;;  %v1802_v48 = vor.u32 %v2036_v46, %v1801_v45 }
  0xbf   :  { %v763_v58 = vadd.f32 %v762_v50, %v750_v51  ;;  %v1803_v50 = vld [vmem:[#allocation8 + $0x98] sm:$0xf0]  ;;  %1117 = vmatpush.bf16.msrb.mxu3 %v1802_v48 }
  0xc0   :  { %v738_v56 = vpop.f32.mrf.mxu1  ;;  %v1806_v52 = vor.u32 %v2035_v47, %v1803_v50 }
  0xc1   :  { %v1794_v56 = vor.u32 %v2034_v54, %v1793_v53  ;;  %v2075_v53 = vld [vmem:[%s2342_s6] ss:$0 sm:$0xff] }
  0xc2   :  { %1143 = vmatpush.bf16.msra.mxu2 %v1806_v52 }
  0xc3   :  { %1118 = vmatpush.bf16.msrb.mxu3 %v1794_v56 }
  0xc4   :  { %v751_v62 = vpop.f32.mrf.mxu2 }
  0xc5   :  { %v764_v7 = vpop.f32.mrf.mxu3  ;;  %v217_v62 = vperm.slane %v2323_v49, 1 }
  0xc6   :  { %1144 = vmatpush.bf16.msra.mxu2 %v1798_v60 }
  0xc7   :  { %1299 = vmatpush.bf16.msra.mxu3 %v2064_v13 }
  0xcc   :  { %v801_v10 = vpop.f32.mrf.mxu2 }
  0xd4   :  { %v803_v19 = vpop.f32.mrf.mxu2 }
  0xd5   :  { %v775_v15 = vpop.f32.mrf.mxu0  ;;  %v2061_v19 = vld [vmem:[#allocation10 + $0x60] sm:$0xff] }
  0xd6   :  { %v776_v18 = vadd.f32 %v775_v15, %v763_v58  ;;  %v2063_v15 = vld [vmem:[#allocation10 + $0x70] sm:$0xff] }
  0xd7   :  { %1300 = vmatpush.bf16.msra.mxu3 %v2063_v15 }
  0xd8   :  { %v788_v21 = vpop.f32.mrf.mxu1 }
  0xd9   :  { %v789_v22 = vadd.f32 %v788_v21, %v776_v18  ;;  %v2053_v18 = vld [vmem:[#allocation10 + $0x20] sm:$0xff]  ;;  %v2060_v21 = vld [vmem:[#allocation10 + $0x58] sm:$0xff] }
  0xda   :  { %1289 = vmatpush.bf16.msra.mxu1 %v2053_v18 }
  0xdb   :  { %v802_v28 = vadd.f32 %v801_v10, %v789_v22  ;;  %1301 = vmatpush.bf16.msra.mxu3 %v2062_v17  ;;  %v2051_v22 = vld [vmem:[#allocation10 + $0x10] sm:$0xff] }
  0xdd   :  { %v896_v31 = vmax.f32 %v802_v28, 0.0  ;;  %v777_v34 = vpop.f32.mrf.mxu0  ;;  %v814_v42 = vpop.f32.mrf.mxu3  ;;  %v2050_v28 = vld [vmem:[#allocation10 + $0x8] sm:$0xff] }
  0xde   :  { %v815_v63 = vadd.f32 %v814_v42, %v217_v62  ;;  %1290 = vmatpush.bf16.msra.mxu1 %v2052_v20  ;;  %v934_v34 = vperm.slane %v932_v33, 0 }
  0xdf   :  { %v898_v39 = vpack.c.bf16 %v896_v31, %v896_v31  ;;  %1302 = vmatpush.bf16.msra.mxu3 %v2061_v19  ;;  %v2049_v31 = vld [vmem:[#allocation10] sm:$0xff] }
  0xe0   :  { %v827_v40 = vpop.f32.mrf.mxu2  ;;  %v790_v44 = vpop.f32.mrf.mxu1 }
  0xe1   :  { %1106 = vmatmul.bf16.vlgmr.msrb.gmra.mxu1 %v898_v39  ;;  %1132 = vmatmul.bf16.vlgmr.msra.gmra.mxu0 %v898_v39  ;;  %v828_v1 = vadd.f32 %v827_v40, %v815_v63 }
  0xe2   :  { %1291 = vmatpush.bf16.msra.mxu1 %v2051_v22 }
  0xe3   :  { %1303 = vmatpush.bf16.msra.mxu3 %v2060_v21 }
  0xe5   :  { %v816_v61 = vpop.f32.mrf.mxu3 }
  0xe6   :  { %1292 = vmatpush.bf16.msra.mxu1 %v2050_v28 }
  0xe7   :  { %1304 = vmatpush.bf16.msra.mxu3 %v2059_v23 }
  0xe8   :  { %v829_v59 = vpop.f32.mrf.mxu2 }
  0xea   :  { %1293 = vmatpush.bf16.msra.mxu1 %v2049_v31 }
  0xeb   :  { %1305 = vmatpush.bf16.msra.mxu3 %v2058_v29 }
  0xef   :  { %1306 = vmatpush.bf16.msra.mxu3 %v2057_v32 }
  0xf5   :  { %v840_v0 = vpop.f32.mrf.mxu0 }
  0xf6   :  { %v841_v5 = vadd.f32 %v840_v0, %v828_v1 }
  0xf8   :  { %v853_v2 = vpop.f32.mrf.mxu1 }
  0xf9   :  { %v854_v8 = vadd.f32 %v853_v2, %v841_v5 }
  0xfd   :  { %v866_v6 = vpop.f32.mrf.mxu3  ;;  %v842_v7 = vpop.f32.mrf.mxu0 }
  0xfe   :  { %v867_v10 = vadd.f32 %v866_v6, %v854_v8 }
 0x100   :  { %v879_v9 = vpop.f32.mrf.mxu2  ;;  %v855_v51 = vpop.f32.mrf.mxu1 }
 0x101   :  { %v880_v30 = vadd.f32 %v879_v9, %v867_v10 }
 0x105   :  { %v868_v4 = vpop.f32.mrf.mxu3  ;;  %v892_v3 = vpop.f32.mrf.mxu0 }
 0x106   :  { %v893_v37 = vadd.f32 %v892_v3, %v880_v30 }
 0x108   :  { %v881_v11 = vpop.f32.mrf.mxu2  ;;  %v897_v43 = vmax.f32 %v893_v37, 0.0 }
 0x10a   :  { %v899_v58 = vpack.c.bf16 %v897_v43, %v897_v43 }
 0x10c   :  { %1119 = vmatmul.bf16.vlgmr.msrb.gmra.mxu3 %v899_v58  ;;  %1145 = vmatmul.bf16.vlgmr.msra.gmra.mxu2 %v899_v58 }
 0x10d   :  { %v894_v49 = vpop.f32.mrf.mxu0 }
 0x15e   :  { %v1107_v24 = vpop.f32.mrf.mxu1  ;;  %v1133_v25 = vpop.f32.mrf.mxu0 }
 0x15f   :  { %v1108_v36 = vadd.f32 %v1107_v24, %v934_v34  ;;  %v1134_v38 = vadd.f32 %v1133_v25, %v935_v35 }
 0x166   :  { %v1109_v26 = vpop.f32.mrf.mxu1  ;;  %v1135_v27 = vpop.f32.mrf.mxu0 }
 0x18f   :  { %v1120_v39 = vpop.f32.mrf.mxu3  ;;  %v1146_v40 = vpop.f32.mrf.mxu2 }
 0x190   :  { %v1121_v41 = vadd.f32 %v1120_v39, %v1108_v36  ;;  %v1147_v42 = vadd.f32 %v1146_v40, %v1134_v38 }
 0x192   :  { %v1150_v44 = vmax.f32 %v1121_v41, 0.0  ;;  %v1151_v45 = vmax.f32 %v1147_v42, 0.0 }
 0x194   :  { %v1152_v46 = vpack.c.bf16 %v1150_v44, %v1150_v44  ;;  %v1153_v47 = vpack.c.bf16 %v1151_v45, %v1151_v45 }
 0x196   :  { %1294 = vmatmul.bf16.vlgmr.msra.gmra.mxu1 %v1152_v46  ;;  %1307 = vmatmul.bf16.vlgmr.msra.gmra.mxu3 %v1153_v47 }
 0x197   :  { %v1122_v48 = vpop.f32.mrf.mxu3  ;;  %v1148_v50 = vpop.f32.mrf.mxu2 }
 0x213   :  { %v1295_v52 = vpop.f32.mrf.mxu1 }
 0x214   :  { %v1296_v54 = vadd.f32 %v2075_v53, %v1295_v52 }
 0x219   :  { %v1308_v55 = vpop.f32.mrf.mxu3 }
 0x21a   :  { %v1309_v56 = vadd.f32 %v1308_v55, %v1296_v54 }
 0x21b   :  { %v1297_v57 = vpop.f32.mrf.mxu1 }
 0x21c   :  { %v1312_v59 = vpack.c.bf16 %v1309_v56, %v1309_v56 }
 0x21e   :  { %1313 = vst [vmem:[#allocation11] sm:$0xf] %v1312_v59 }
 0x21f   :  { %1324 = dma.vmem_to_hbm [thread:$0]  %s1320_s29, 64, %s1322_s9, [#allocation4]  }
 0x221   :  { %v1310_v60 = vpop.f32.mrf.mxu3 }
 0x222   :  { %2226 = dma.done.wait [#allocation4], 64  }
 0x223   :  { %2227 = vsyncadd [#allocation4], 4294967232 }
 0x224   :  { %1329 = vsyncpa [#allocation3], 1 }
 0x225   :  { %1330 = vsyncpa [#allocation6], 1 }
 0x226   :  { %1331 = vsyncpa [#allocation9], 1 }
 0x227   :  { %1332 = vsyncpa [#allocation4], 1 }

</bundles_post_ra>
